<compile_context>
chip_gen: v5e
topology: v5e:2x2
jax: 0.10.0
libtpu: 0.0.40
codegen_flags: <defaults>
</compile_context>

<pallas_src>
import jax
import jax.numpy as jnp
from jax.experimental import pallas as pl
from jax.experimental.pallas import tpu as pltpu


def _mask_sequence_kernel(m_ref, x_ref, y_ref):
    # m_ref: (ROWS, 1) multiplier in x.dtype (0.0 / 1.0); broadcasts over lanes.
    y_ref[...] = x_ref[...] * m_ref[...]


def _round_down(v, m):
    return (v // m) * m


def mask_sequence(x, p, key):
    """x: [B, T, D]. Returns (x * mask, mask) with mask bool of shape [B, T, 1]."""
    B, T, D = x.shape
    BT = B * T
    itemsize = jnp.dtype(x.dtype).itemsize

    # --- keep mask drawn in the wrapper (B*T elements; XLA fuses it) --------
    rand_dtype = x.dtype if jnp.issubdtype(x.dtype, jnp.floating) else jnp.float32
    u = jax.random.uniform(key, (B, T, 1), dtype=rand_dtype)
    mask = u > jnp.asarray(p, dtype=rand_dtype)          # bool [B, T, 1]
    mult = mask.astype(x.dtype).reshape(BT, 1)           # per-row multiplier

    x2 = x.reshape(BT, D)

    # --- generation-aware tile sizing ---------------------------------------
    try:
        vmem_cap = int(pltpu.get_tpu_info().vmem_capacity_bytes)
    except Exception:
        vmem_cap = 128 * 1024 * 1024
    if vmem_cap <= 64 * 1024 * 1024:          # v7x: 64 MiB VMEM per TensorCore
        target_tile_bytes = 6 * 1024 * 1024
    else:                                     # v5e / v6e: 128 MiB VMEM
        target_tile_bytes = 12 * 1024 * 1024

    row_bytes = D * itemsize
    if row_bytes <= target_tile_bytes:
        COLS = D
        rows = target_tile_bytes // row_bytes
        ROWS = BT if rows >= BT else max(8, _round_down(rows, 8))
    else:
        # Very wide rows: tile D as well (ROWS only needs to be a multiple of 8
        # now that the lane-dense mask output is gone).
        ROWS = BT if BT <= 8 else 8
        cols = target_tile_bytes // (ROWS * itemsize)
        COLS = max(128, _round_down(cols, 128))
        if COLS >= D:
            COLS = D

    grid = (pl.cdiv(BT, ROWS), pl.cdiv(D, COLS))

    # --- honest VMEM accounting: double-buffered x + y tiles plus the
    #     lane/sublane-padded multiplier buffers, + headroom. -----------------
    tile_bytes = ROWS * COLS * itemsize
    mult_tile_bytes = ((ROWS + 31) // 32) * 32 * 128 * itemsize
    vmem_limit = 4 * tile_bytes + 2 * mult_tile_bytes + 4 * 1024 * 1024
    vmem_limit = int(min(max(vmem_limit, 16 * 1024 * 1024), (vmem_cap * 3) // 4))

    # --- v7x: get both TensorCores issuing DMAs on the row axis -------------
    row_sem = pltpu.PARALLEL
    try:
        if "v7" in jax.devices()[0].device_kind.lower():
            row_sem = pltpu.CORE_PARALLEL
    except Exception:
        pass

    cost = pl.CostEstimate(
        flops=BT * D,
        transcendentals=0,
        bytes_accessed=2 * BT * D * itemsize + BT * itemsize,
    )

    y2 = pl.pallas_call(
        _mask_sequence_kernel,
        out_shape=jax.ShapeDtypeStruct((BT, D), x.dtype),
        grid=grid,
        in_specs=[
            pl.BlockSpec((ROWS, 1), lambda i, j: (i, 0)),      # per-row multiplier
            pl.BlockSpec((ROWS, COLS), lambda i, j: (i, j)),   # x tile
        ],
        out_specs=pl.BlockSpec((ROWS, COLS), lambda i, j: (i, j)),
        compiler_params=pltpu.CompilerParams(
            dimension_semantics=(row_sem, pltpu.PARALLEL),
            vmem_limit_bytes=vmem_limit,
        ),
        cost_estimate=cost,
    )(mult, x2)

    return y2.reshape(B, T, D), mask


if __name__ == "__main__":
    key = jax.random.PRNGKey(0)
    k_x, k_mask = jax.random.split(key)

    B, T, D = 2, 8, 32
    p = 0.5

    x = jax.random.normal(k_x, (B, T, D), dtype=jnp.float32)

    y, mask = mask_sequence(x, p, k_mask)
    jax.block_until_ready((y, mask))

    # Consistency checks: y == x where mask is True, y == 0 where mask is False.
    assert y.shape == (B, T, D)
    assert mask.shape == (B, T, 1)
    assert mask.dtype == jnp.bool_
    mask_f = mask.astype(x.dtype)
    assert jnp.allclose(y, x * mask_f), "masked output mismatch"

    print("KERNEL_OK")
</pallas_src>

<mosaic_0001>
module attributes {stable_mosaic.version = 11 : i64} {
  func.func @_mask_sequence_kernel(%arg0: i32, %arg1: i32, %arg2: memref<16x1xf32, #tpu.memory_space<vmem>>, %arg3: memref<16x32xf32, #tpu.memory_space<vmem>>, %arg4: memref<16x32xf32, #tpu.memory_space<vmem>>) attributes {dimension_semantics = [#tpu.dimension_semantics<parallel>, #tpu.dimension_semantics<parallel>], iteration_bounds = array<i64: 1, 1>, scalar_prefetch = 0 : i64, scratch_operands = 0 : i64, tpu.core_type = #tpu.core_type<tc>, window_params = [{transform_indices = @transform_0, window_bounds = array<i64: 16, 1>}, {transform_indices = @transform_1, window_bounds = array<i64: 16, 32>}, {transform_indices = @transform_2, window_bounds = array<i64: 16, 32>}]} {
    %c0 = arith.constant 0 : index
    %c0_0 = arith.constant 0 : index
    %0 = vector.load %arg3[%c0, %c0_0] : memref<16x32xf32, #tpu.memory_space<vmem>>, vector<16x32xf32>
    %c0_1 = arith.constant 0 : index
    %c0_2 = arith.constant 0 : index
    %1 = vector.load %arg2[%c0_1, %c0_2] : memref<16x1xf32, #tpu.memory_space<vmem>>, vector<16x1xf32>
    %2 = vector.broadcast %1 : vector<16x1xf32> to vector<16x32xf32>
    %3 = arith.mulf %0, %2 : vector<16x32xf32>
    %c0_3 = arith.constant 0 : index
    %c0_4 = arith.constant 0 : index
    %4 = vector.load %arg4[%c0_3, %c0_4] : memref<16x32xf32, #tpu.memory_space<vmem>>, vector<16x32xf32>
    tpu.vector_store %arg4[%c0_3, %c0_4], %3 {strides = array<i32>} : memref<16x32xf32, #tpu.memory_space<vmem>>, vector<16x32xf32>,
    return
  }
  func.func @transform_0(%arg0: i32, %arg1: i32) -> (i32, i32) {
    %c0_i32 = arith.constant 0 : i32
    %c0_i32_0 = arith.constant 0 : i32
    return %arg0, %c0_i32 : i32, i32
  }
  func.func @transform_1(%arg0: i32, %arg1: i32) -> (i32, i32) {
    %c0_i32 = arith.constant 0 : i32
    return %arg0, %arg1 : i32, i32
  }
  func.func @transform_2(%arg0: i32, %arg1: i32) -> (i32, i32) {
    %c0_i32 = arith.constant 0 : i32
    return %arg0, %arg1 : i32, i32
  }
}

</mosaic_0001>

<bundles_post_ra>
// kernel: tpu_custom_call.1
= control target key start
LH: loop header
LB: loop body
LE: loop exit
PB: predicated region body
PF: predicated region fallthrough
CT: control target
= control target key end

     0   :  { %s114_s0 = inlined_call_operand.vmem [shape: f32[16,1], index: 0, kind: input, shape index: {}]   ;;  %s115_s1 = inlined_call_operand.vmem [shape: f32[16,32], index: 1, kind: input, shape index: {}]   ;;  %s116_s2 = inlined_call_operand.hbm [shape: f32[16,32], index: 2, kind: output, shape index: {}]  }
   0x1   :  { %v14_v0 = vld [vmem:[%s114_s0] sm:$0xff] }
   0x2   :  { %7 = vsyncpa [#allocation3], 0  ;;  %v80_v1 = vmov 0   ;;  %v15_v2 = vld [vmem:[%s114_s0 + $0x8] sm:$0xff]  ;;  %v12_v3 = vld [vmem:[%s115_s1] sm:$0xff]  ;;  %vm28_vm0 = vcmask 261120  }
   0x3   :  { %53 = vset.pattern.permute.xlu0 %v80_v1  ;;  %s81_s15 = smov [#allocation2]   ;;  %s37_s19 = sshll.u32 %s116_s2, 4  ;;  %v13_v6 = vld [vmem:[%s115_s1 + $0x8] sm:$0xff]  ;;  %s38_s19 = int_to_ptr.hbm [resolvable:$true] %s37_s19 }
   0x4   :  { %18 = vperm.xlu0 %53, %v14_v0   ;;  %s35_s16 = sshll.u32 %s81_s15, 4  ;;  %s82_s0 = smov 128   ;;  %s36_s16 = int_to_ptr.vmem [resolvable:$true] %s35_s16 }
   0x5   :  { %s83_s22 = smov 8  }
   0xc   :  { %23 = vperm.xlu0 %53, %v15_v2  }
  0x76   :  { %v19_v4 = vpop.permute.xlu0 %18 }
  0x77   :  { %v26_v5 = vmul.f32 %v19_v4, %v12_v3 }
  0x79   :  { %29 = vst.msk [vmem:[#allocation2] sm:$0xff] %vm28_vm0, %v26_v5 }
  0x7e   :  { %v24_v7 = vpop.permute.xlu0 %23 }
  0x7f   :  { %v27_v8 = vmul.f32 %v24_v7, %v13_v6 }
  0x81   :  { %30 = vst.msk [vmem:[#allocation2 + $0x8] sm:$0xff] %vm28_vm0, %v27_v8 }
  0x82   :  { %43 = dma.vmem_to_hbm [thread:$0]  %s36_s16, 256, %s38_s19, [#allocation3], %s82_s0, %s82_s0, %s83_s22  }
  0x83   :  { %78 = dma.done.wait [#allocation3], 256  }
  0x84   :  { %79 = vsyncadd [#allocation3], 4294967040 }
  0x85   :  { %48 = vsyncpa [#allocation3], 1 }

</bundles_post_ra>
